<compile_context>
chip_gen: v7x
topology: tpu7x:2x2x1
jax: 0.10.0
libtpu: 0.0.40
codegen_flags: <defaults>
</compile_context>

<pallas_src>
import functools

import jax
import jax.numpy as jnp
from jax.experimental import pallas as pl
from jax.experimental.pallas import tpu as pltpu


def _round_up(x, m):
    return -(-x // m) * m


def _round_down(x, m):
    return (x // m) * m


def _padded_bytes(rows, cols, itemsize):
    """VMEM footprint of a (rows, cols) tile after (8, 128) layout padding."""
    return _round_up(rows, 8) * _round_up(cols, 128) * itemsize


def _vmem_params():
    """(double-buffered working-set budget, vmem_limit_bytes) per TPU gen."""
    kind = ""
    try:
        kind = jax.devices()[0].device_kind.lower()
    except Exception:
        pass
    if "v5" in kind or "v6" in kind:
        # 128 MiB physical VMEM: allow ~64 MiB of pipelined tiles.
        return 64 * 1024 * 1024, 96 * 1024 * 1024
    if "7" in kind:
        # v7x: 64 MiB physical per TensorCore -> keep working set ~24 MiB.
        return 24 * 1024 * 1024, 44 * 1024 * 1024
    # Unknown / older parts: stay under the smallest scoped-VMEM defaults.
    return 12 * 1024 * 1024, None


def _pick_tiles(B, F, x_itemsize, budget, tb_override=None, tk_override=None):
    """Pick (TB rows per batch tile, TK cols per feature chunk)."""
    b_ceil8 = _round_up(B, 8)
    f_pad = _round_up(F, 128)

    if tb_override is not None:
        if tb_override % 8 != 0:
            raise ValueError("tile_b must be a multiple of 8")
        tb = tb_override
    else:
        # ~4 MiB of x per grid step hits ~85% of the measured HBM streaming
        # roofline; the ~0.35 us fixed per-step overhead dominates below that.
        tb = max(512, (4 * 1024 * 1024) // (f_pad * x_itemsize))
        tb = min(max(8, _round_down(tb, 8)), b_ceil8, 8192)

    if tk_override is not None:
        if tk_override != F and tk_override % 128 != 0:
            raise ValueError("tile_k must equal F or be a multiple of 128")
        return tb, (F if tk_override >= F else tk_override)

    tk = F

    def fits(tb_, tk_):
        return (2 * _padded_bytes(tb_, tk_, x_itemsize)   # double-buffered x
                + 2 * _padded_bytes(1, tk_, 4)            # weight buffers
                + 3 * _padded_bytes(1, tb_, 4)            # out buffers + acc
                ) <= budget

    # Shrink the batch tile first ...
    while tb_override is None and tb > 256 and not fits(tb, tk):
        tb = max(256, _round_down(tb // 2, 8))

    # ... then chunk the feature dim into lane-aligned (multiple-of-128) chunks.
    if not fits(tb, tk):
        tb_pad = _round_up(tb, 8)
        avail = max(budget - 3 * _padded_bytes(1, tb, 4), 0)
        denom = 2 * tb_pad * x_itemsize + 64    # per-column: x dbl-buf + w dbl-buf
        tk = max(128, _round_down(avail // denom, 128))
        tk = min(tk, f_pad)
        if tk >= F:
            tk = F
    return tb, tk


def _classifier_kernel(x_ref, w_ref, b_ref, o_ref, acc_ref, *,
                       apply_sigmoid, num_k, tk, num_features):
    # x_ref: (TB, TK) VMEM tile of the input batch.
    # w_ref: (1, TK) VMEM weight chunk (lane-dense; re-fetched only when k changes).
    # b_ref: (1,) SMEM bias scalar.
    # o_ref: (1, TB) lane-dense output row for this batch tile.
    # acc_ref: (1, TB) f32 accumulator scratch (resident across the k axis).
    k = pl.program_id(1)

    @pl.when(k == 0)
    def _init():
        acc_ref[...] = jnp.zeros_like(acc_ref)

    x = x_ref[...].astype(jnp.float32)        # upcast: supports bf16 inputs
    w = w_ref[...].astype(jnp.float32)        # (1, TK) broadcasts over rows
    xw = x * w                                # VPU
    if num_features % tk != 0:
        # Ragged last feature chunk: out-of-range columns hold unspecified
        # data and must not reach the reduction.
        col = k * tk + jax.lax.broadcasted_iota(jnp.int32, (1, tk), 1)
        xw = jnp.where(col < num_features, xw, 0.0)
    # XLU lane reduce -> per-row partial sums, stored lane-dense as (1, TB).
    acc_ref[...] += jnp.sum(xw, axis=-1)[None, :]

    @pl.when(k == num_k - 1)
    def _finalize():
        y = acc_ref[...] + b_ref[0]
        if apply_sigmoid:
            y = jax.nn.sigmoid(y)             # EUP
        o_ref[...] = y.astype(o_ref.dtype)


def classifier_forward(x, weight, bias, apply_sigmoid=False, *,
                       tile_b=None, tile_k=None):
    """Pallas equivalent of Classifier.forward.

    x:      (B, F) float32 or bfloat16
    weight: (1, F) float32 or bfloat16 (PyTorch nn.Linear layout, lane-dense)
    bias:   (1,)   float
    returns (B,)   float32
    """
    B, F = x.shape
    budget, vmem_limit = _vmem_params()
    TB, TK = _pick_tiles(B, F, jnp.dtype(x.dtype).itemsize, budget,
                         tb_override=tile_b, tk_override=tile_k)

    num_b = pl.cdiv(B, TB)     # ragged last batch tile handled by Pallas (no pad)
    num_k = pl.cdiv(F, TK)     # feature-chunk reduction axis (innermost, "arbitrary")

    w = weight.reshape(1, F)
    b = bias.reshape(1).astype(jnp.float32)

    kernel = functools.partial(_classifier_kernel, apply_sigmoid=apply_sigmoid,
                               num_k=num_k, tk=TK, num_features=F)

    cp_kwargs = dict(dimension_semantics=("parallel", "arbitrary"))
    if vmem_limit is not None:
        cp_kwargs["vmem_limit_bytes"] = int(vmem_limit)

    out = pl.pallas_call(
        kernel,
        out_shape=jax.ShapeDtypeStruct((num_b, TB), jnp.float32),
        grid=(num_b, num_k),
        in_specs=[
            pl.BlockSpec((TB, TK), lambda i, k: (i, k)),          # x tiles
            pl.BlockSpec((1, TK), lambda i, k: (0, k)),           # weight chunk
            pl.BlockSpec(memory_space=pltpu.MemorySpace.SMEM),    # bias scalar
        ],
        out_specs=pl.BlockSpec((1, TB), lambda i, k: (i, 0)),     # lane-dense rows
        scratch_shapes=[pltpu.VMEM((1, TB), jnp.float32)],        # accumulator
        compiler_params=pltpu.CompilerParams(**cp_kwargs),
    )(x, w, b)
    return out.reshape(-1)[:B]   # drop tile padding, flatten -> (B,)


if __name__ == "__main__":
    key = jax.random.PRNGKey(0)
    k_x, k_w, k_b, k_x2, k_w2, k_b2 = jax.random.split(key, 6)

    # --- Primary demo at small shapes implied by the module: B=8, F=32 ----
    B, F = 8, 32
    x = jax.random.normal(k_x, (B, F), dtype=jnp.float32)
    bound = 1.0 / (F ** 0.5)
    weight = jax.random.uniform(k_w, (1, F), minval=-bound, maxval=bound,
                                dtype=jnp.float32)
    bias = jax.random.uniform(k_b, (1,), minval=-bound, maxval=bound,
                              dtype=jnp.float32)

    # Pure-VPU f32 reference (avoids MXU default-precision ambiguity).
    ref = jnp.sum(x * weight, axis=-1) + bias[0]

    y = jax.block_until_ready(classifier_forward(x, weight, bias))
    y_sig = jax.block_until_ready(
        classifier_forward(x, weight, bias, apply_sigmoid=True))
    assert y.shape == (B,) and y_sig.shape == (B,)
    assert jnp.allclose(y, ref, atol=1e-5), "logits mismatch"
    assert jnp.allclose(y_sig, jax.nn.sigmoid(ref), atol=1e-5), "sigmoid mismatch"

    # --- bf16 input path (halves HBM x bytes; accumulation stays f32) -----
    x_bf, w_bf = x.astype(jnp.bfloat16), weight.astype(jnp.bfloat16)
    ref_bf = jnp.sum(x_bf.astype(jnp.float32) * w_bf.astype(jnp.float32),
                     axis=-1) + bias[0]
    y_bf = jax.block_until_ready(classifier_forward(x_bf, w_bf, bias))
    assert jnp.allclose(y_bf, ref_bf, atol=1e-5), "bf16 mismatch"

    # --- Ragged batch + F-chunk accumulation path (forced small tiles) ----
    B2, F2 = 21, 200
    x2 = jax.random.normal(k_x2, (B2, F2), dtype=jnp.float32)
    bound2 = 1.0 / (F2 ** 0.5)
    w2 = jax.random.uniform(k_w2, (1, F2), minval=-bound2, maxval=bound2,
                            dtype=jnp.float32)
    b2 = jax.random.uniform(k_b2, (1,), minval=-bound2, maxval=bound2,
                            dtype=jnp.float32)
    ref2 = jax.nn.sigmoid(jnp.sum(x2 * w2, axis=-1) + b2[0])
    y2 = jax.block_until_ready(
        classifier_forward(x2, w2, b2, apply_sigmoid=True, tile_b=8, tile_k=128))
    assert y2.shape == (B2,)
    assert jnp.allclose(y2, ref2, atol=1e-5), "chunked/ragged mismatch"

    print("KERNEL_OK")
</pallas_src>

<mosaic_0001>
module attributes {stable_mosaic.version = 11 : i64} {
  func.func @_classifier_kernel(%arg0: i32, %arg1: i32, %arg2: memref<8x32xf32, #tpu.memory_space<vmem>>, %arg3: memref<1x32xf32, #tpu.memory_space<vmem>>, %arg4: memref<1xf32, #tpu.memory_space<smem>>, %arg5: memref<1x8xf32, #tpu.memory_space<vmem>>, %arg6: memref<1x8xf32, #tpu.memory_space<vmem>>) attributes {dimension_semantics = [#tpu.dimension_semantics<parallel>, #tpu.dimension_semantics<arbitrary>], iteration_bounds = array<i64: 1, 1>, scalar_prefetch = 0 : i64, scratch_operands = 1 : i64, tpu.core_type = #tpu.core_type<tc>, window_params = [{transform_indices = @transform_0, window_bounds = array<i64: 8, 32>}, {transform_indices = @transform_1, window_bounds = array<i64: 1, 32>}, {transform_indices = @transform_2, window_bounds = array<i64: 1>}, {transform_indices = @transform_3, window_bounds = array<i64: 1, 8>}]} {
    %c0_i32 = arith.constant 0 : i32
    %0 = arith.cmpi eq, %arg1, %c0_i32 : i32
    %1 = arith.extui %0 : i1 to i32
    %c0_i32_0 = arith.constant 0 : i32
    %2 = arith.cmpi ne, %1, %c0_i32_0 : i32
    scf.if %2 {
      %cst_10 = arith.constant 0.000000e+00 : f32
      %15 = vector.broadcast %cst_10 : f32 to vector<1x8xf32>
      %c0_11 = arith.constant 0 : index
      %c0_12 = arith.constant 0 : index
      %16 = vector.load %arg6[%c0_11, %c0_12] : memref<1x8xf32, #tpu.memory_space<vmem>>, vector<1x8xf32>
      tpu.vector_store %arg6[%c0_11, %c0_12], %15 {strides = array<i32>} : memref<1x8xf32, #tpu.memory_space<vmem>>, vector<1x8xf32>,
    } else {
    }
    %c0 = arith.constant 0 : index
    %c0_1 = arith.constant 0 : index
    %3 = vector.load %arg2[%c0, %c0_1] : memref<8x32xf32, #tpu.memory_space<vmem>>, vector<8x32xf32>
    %c0_2 = arith.constant 0 : index
    %c0_3 = arith.constant 0 : index
    %4 = vector.load %arg3[%c0_2, %c0_3] : memref<1x32xf32, #tpu.memory_space<vmem>>, vector<1x32xf32>
    %5 = vector.broadcast %4 : vector<1x32xf32> to vector<8x32xf32>
    %6 = arith.mulf %3, %5 : vector<8x32xf32>
    %c0_4 = arith.constant 0 : index
    %c0_5 = arith.constant 0 : index
    %7 = vector.load %arg6[%c0_4, %c0_5] : memref<1x8xf32, #tpu.memory_space<vmem>>, vector<1x8xf32>
    %cst = arith.constant dense<0.000000e+00> : vector<8xf32>
    %8 = vector.multi_reduction <add>, %6, %cst [1] : vector<8x32xf32> to vector<8xf32>
    %9 = vector.shape_cast %8 : vector<8xf32> to vector<1x8xf32>
    %10 = arith.addf %7, %9 : vector<1x8xf32>
    %c0_6 = arith.constant 0 : index
    %c0_7 = arith.constant 0 : index
    %11 = vector.load %arg6[%c0_6, %c0_7] : memref<1x8xf32, #tpu.memory_space<vmem>>, vector<1x8xf32>
    tpu.vector_store %arg6[%c0_6, %c0_7], %10 {strides = array<i32>} : memref<1x8xf32, #tpu.memory_space<vmem>>, vector<1x8xf32>,
    %c0_i32_8 = arith.constant 0 : i32
    %12 = arith.cmpi eq, %arg1, %c0_i32_8 : i32
    %13 = arith.extui %12 : i1 to i32
    %c0_i32_9 = arith.constant 0 : i32
    %14 = arith.cmpi ne, %13, %c0_i32_9 : i32
    scf.if %14 {
      %c0_10 = arith.constant 0 : index
      %c0_11 = arith.constant 0 : index
      %15 = vector.load %arg6[%c0_10, %c0_11] : memref<1x8xf32, #tpu.memory_space<vmem>>, vector<1x8xf32>
      %c0_12 = arith.constant 0 : index
      %16 = memref.load %arg4[%c0_12] : memref<1xf32, #tpu.memory_space<smem>>
      %17 = vector.broadcast %16 : f32 to vector<1x8xf32>
      %18 = arith.addf %15, %17 : vector<1x8xf32>
      %c0_13 = arith.constant 0 : index
      %c0_14 = arith.constant 0 : index
      %19 = vector.load %arg5[%c0_13, %c0_14] : memref<1x8xf32, #tpu.memory_space<vmem>>, vector<1x8xf32>
      tpu.vector_store %arg5[%c0_13, %c0_14], %18 {strides = array<i32>} : memref<1x8xf32, #tpu.memory_space<vmem>>, vector<1x8xf32>,
    } else {
    }
    return
  }
  func.func @transform_0(%arg0: i32, %arg1: i32) -> (i32, i32) {
    %c0_i32 = arith.constant 0 : i32
    return %arg0, %arg1 : i32, i32
  }
  func.func @transform_1(%arg0: i32, %arg1: i32) -> (i32, i32) {
    %c0_i32 = arith.constant 0 : i32
    %c0_i32_0 = arith.constant 0 : i32
    return %c0_i32, %arg1 : i32, i32
  }
  func.func @transform_2(%arg0: i32, %arg1: i32) -> i32 {
    %c0_i32 = arith.constant 0 : i32
    %c0_i32_0 = arith.constant 0 : i32
    return %c0_i32 : i32
  }
  func.func @transform_3(%arg0: i32, %arg1: i32) -> (i32, i32) {
    %c0_i32 = arith.constant 0 : i32
    %c0_i32_0 = arith.constant 0 : i32
    return %arg0, %c0_i32 : i32, i32
  }
}

</mosaic_0001>

<bundles_post_ra>
// kernel: tpu_custom_call.1
= control target key start
LH: loop header
LB: loop body
LE: loop exit
PB: predicated region body
PF: predicated region fallthrough
CT: control target
= control target key end

     0   :  { %9 = vsyncpa [#allocation5], 0  ;;  %s293_s0 = inlined_call_operand.hbm [shape: f32[8,32], index: 0, kind: input, shape index: {}]   ;;  %s294_s1 = inlined_call_operand.vmem [shape: f32[1,32], index: 1, kind: input, shape index: {}]   ;;  %s295_s2 = inlined_call_operand.<no memory space> [shape: f32[1], index: 2, kind: input, shape index: {}]   ;;  %s296_s3 = inlined_call_operand.hbm [shape: f32[1,8], index: 3, kind: output, shape index: {}]  }
   0x1   :  { %10 = vsyncpa [#allocation6], 0  ;;  %s235_s12 = smov [#allocation4]   ;;  %s187_s16 = scalar_lea.hbm %s293_s0, 128 }
   0x2   :  { %s17_s13 = sshll.u32 %s235_s12, 4  ;;  %p188_p0 = scmp.ne.s32.totalorder %s293_s0, %s187_s16  ;;  %s18_s13 = int_to_ptr.vmem [resolvable:$true] %s17_s13 }
   0x3   :  { %p191_p1 = scmp.lt.u32.totalorder %s187_s16, %s293_s0 }
   0x5   :  { %p193_p2 = pnand %p191_p1, %p188_p0 }
   0x7   :  { %196 = shalt.err (!%p193_p2)
}
   0x8   :  { %s197_s21 = scalar_lea.vmem %s18_s13, 128  ;;  %p202_p4 = scmp.lt.s32.totalorder %s18_s13, %s18_s13 }
   0x9   :  { %p198_p3 = scmp.ne.s32.totalorder %s18_s13, %s197_s21  ;;  %p203_p5 = scmp.lt.s32.totalorder %s197_s21, %s197_s21 }
   0xb   :  { %p204_p6 = por %p203_p5, %p202_p4 }
   0xd   :  { %p205_p7 = pnand %p204_p6, %p198_p3 }
   0xf   :  { %208 = shalt.err (!%p205_p7)
}
  0x10   :  { %20 = dma.hbm_to_vmem [thread:$0]  %s293_s0, 128, %s18_s13, [#allocation5]  }
  0x11   :  { %231 = dma.done.wait [#allocation5], 128  }
  0x12   :  { %232 = vsyncadd [#allocation5], 4294967168  ;;  %v34_v0 = vld [vmem:[#allocation4] sm:$0xff]  ;;  %v180_v1 = vld [vmem:[%s294_s1] ss:$0 sm:$0xff]  ;;  %vm44_vm0 = vcmask 261120   ;;  %v49_v5 = vlaneseq  ;;  %v162_v50 = vstv %s295_s2 }
  0x13   :  { %v42_v2 = vmul.f32 %v180_v1, %v34_v0  ;;  %v236_v4 = vmov 0   ;;  %v237_v9 = vmov 1966171168   ;;  %vm32_vm1 = vcmask 57344   ;;  %s239_s26 = smov [#allocation7]  }
  0x14   :  { %186 = vset.pattern.permute.xlu0 %v236_v4  ;;  %v50_v6 = vshrl.u32 %v49_v5, 7  ;;  %v134_v7 = vand.u32 127, %v49_v5  ;;  %v86_v10 = vunpack.c.l.s4 %v237_v9  ;;  %v238_v43 = vmov 0.0   ;;  %s171_s27 = sshll.u32 %s239_s26, 4  ;;  %s172_s27 = int_to_ptr.vmem [resolvable:$true] %s171_s27 }
  0x15   :  { %v45_v3 = vsel %vm44_vm0, %v42_v2, 0.0  ;;  %33 = vst.msk [vmem:[#allocation2] sm:$0x1] %vm32_vm1, %v238_v43  ;;  %s209_s28 = scalar_lea.vmem %s172_s27, 16  ;;  %s213_s29 = scalar_lea.vmem %s172_s27, 32 }
  0x16   :  { %46 = vadd.xlane.f32.xlu0 %v45_v3  ;;  %v137_v8 = vsub.s32 %v134_v7, %v50_v6  ;;  %v87_v11 = vunpack.c.0.s8 %v86_v10  ;;  %v51_v12 = vsub.s32 0, %v50_v6  ;;  %v55_v13 = vsub.s32 1, %v50_v6  ;;  %p210_p8 = scmp.ne.s32.totalorder %s172_s27, %s209_s28  ;;  %p214_p9 = scmp.lt.s32.totalorder %s172_s27, %s172_s27 }
  0x17   :  { %v59_v14 = vsub.s32 2, %v50_v6  ;;  %v63_v15 = vsub.s32 3, %v50_v6  ;;  %v67_v16 = vsub.s32 4, %v50_v6  ;;  %v71_v17 = vsub.s32 5, %v50_v6  ;;  %p215_p10 = scmp.lt.s32.totalorder %s213_s29, %s209_s28 }
  0x18   :  { %v75_v18 = vsub.s32 6, %v50_v6  ;;  %v79_v19 = vsub.s32 7, %v50_v6  ;;  %v90_v21 = vsub.s32 %v87_v11, %v50_v6 }
  0x19   :  { %p216_p11 = por %p215_p10, %p214_p9 }
  0x1b   :  { %p217_p12 = pnand %p216_p11, %p210_p8 }
  0x1c   :  { %v43_v47 = vld [vmem:[#allocation2] sm:$0x1] }
  0xa3   :  { %v47_v20 = vpop.xlane.xlu0 %46 }
  0xa4   :  { %v52_v22 = vrot.slane %v47_v20, %v51_v12  ;;  %v56_v23 = vrot.slane %v47_v20, %v55_v13  ;;  %v60_v24 = vrot.slane %v47_v20, %v59_v14  ;;  %v64_v25 = vrot.slane %v47_v20, %v63_v15 }
  0xa5   :  { %v68_v26 = vrot.slane %v47_v20, %v67_v16  ;;  %v72_v27 = vrot.slane %v47_v20, %v71_v17  ;;  %v76_v28 = vrot.slane %v47_v20, %v75_v18  ;;  %v80_v29 = vrot.slane %v47_v20, %v79_v19 }
  0xa6   :  { %v81_v30 = vcombine.low %v52_v22, %v56_v23  ;;  %v82_v31 = vcombine.low %v60_v24, %v64_v25 }
  0xa7   :  { %v83_v32 = vcombine.low %v68_v26, %v72_v27  ;;  %v84_v33 = vcombine.low %v76_v28, %v80_v29 }
  0xa8   :  { %v91_v34 = vrot.slane %v81_v30, %v90_v21  ;;  %v98_v35 = vrot.slane %v82_v31, %v90_v21 }
  0xa9   :  { %v105_v36 = vrot.slane %v83_v32, %v90_v21  ;;  %v112_v37 = vrot.slane %v84_v33, %v90_v21 }
  0xaa   :  { %v113_v38 = vcombine.low %v91_v34, %v98_v35 }
  0xab   :  { %v114_v39 = vcombine.low %v105_v36, %v112_v37 }
  0xac   :  { %v121_v40 = vrot.slane %v113_v38, %v90_v21 }
  0xad   :  { %v128_v41 = vrot.slane %v114_v39, %v90_v21 }
  0xaf   :  { %v129_v42 = vcombine.low %v121_v40, %v128_v41 }
  0xb1   :  { %131 = vperm.xlu0 %186, %v129_v42  }
 0x130   :  { %v132_v44 = vpop.permute.xlu0 %131 }
 0x131   :  { %v138_v45 = vrot.slane %v132_v44, %v137_v8 }
 0x133   :  { %v145_v46 = vrot.slane %v138_v45, %v90_v21 }
 0x135   :  { %v152_v48 = vrot.slane %v145_v46, %v90_v21 }
 0x137   :  { %v154_v49 = vadd.f32 %v152_v48, %v43_v47 }
 0x139   :  { %156 = vst.msk [vmem:[#allocation2] sm:$0x1] %vm32_vm1, %v154_v49 }
 0x140   :  { %v160_v51 = vld [vmem:[#allocation2] sm:$0x1] }
 0x141   :  { %v163_v52 = vadd.f32 %v162_v50, %v160_v51 }
 0x143   :  { %164 = vst.msk [vmem:[#allocation7] sm:$0x1] %vm32_vm1, %v163_v52 }
 0x144   :  { %220 = shalt.err (!%p217_p12)
}
 0x145   :  { %s221_s5 = scalar_lea.hbm %s296_s3, 16 }
 0x146   :  { %p222_p13 = scmp.ne.s32.totalorder %s296_s3, %s221_s5  ;;  %p225_p0 = scmp.lt.u32.totalorder %s221_s5, %s296_s3 }
 0x148   :  { %p227_p1 = pnand %p225_p0, %p222_p13 }
 0x14a   :  { %230 = shalt.err (!%p227_p1)
}
 0x14b   :  { %174 = dma.vmem_to_hbm [thread:$0]  %s172_s27, 16, %s296_s3, [#allocation6]  }
 0x14c   :  { %233 = dma.done.wait [#allocation6], 16  }
 0x14d   :  { %234 = vsyncadd [#allocation6], 4294967280 }
 0x14e   :  { %178 = vsyncpa [#allocation5], 1 }
 0x14f   :  { %179 = vsyncpa [#allocation6], 1 }

</bundles_post_ra>
